<compile_context>
chip_gen: v5e
topology: v5e:2x2
jax: 0.10.0
libtpu: 0.0.40
codegen_flags: <defaults>
</compile_context>

<pallas_src>
import functools

import jax
import jax.numpy as jnp
from jax.experimental import pallas as pl
from jax.experimental.pallas import tpu as pltpu

LANE = 128      # TPU vreg lane width  (last dim)
SUBLANE = 8     # TPU vreg sublane width (second-to-last dim)


def _round_up(x, m):
    return (x + m - 1) // m * m


def _qnet_kernel(x_ref, w_ref, b_ref, o_ref):
    # x_ref: (tm, K)      activations tile
    # w_ref: (Npad, K)    weight in PyTorch layout (no transpose materialized)
    # b_ref: (1, Npad)    bias, lane-padded, f32
    # o_ref: (tm, Npad)   lane-dense output tile
    acc = jax.lax.dot_general(
        x_ref[...], w_ref[...],
        dimension_numbers=(((1,), (1,)), ((), ())),   # contract K with K == x @ w.T
        preferred_element_type=jnp.float32,           # f32 accumulation on MXU
    )
    o_ref[...] = (acc + b_ref[...].astype(jnp.float32)).astype(o_ref.dtype)


def q_net_forward(x, weight, bias, *, compute_dtype=None, block_m=256):
    """Computes x @ weight.T + bias (PyTorch nn.Linear semantics).

    x:      (batch, hidden_dim)
    weight: (dout, hidden_dim)   -- PyTorch layout, NOT pre-transposed
    bias:   (dout,)
    compute_dtype: optionally cast x/weight (e.g. jnp.bfloat16) feeding the MXU;
                   accumulation and bias add stay in f32.
    """
    batch, hidden = x.shape
    dout, hidden_w = weight.shape
    assert hidden == hidden_w, "weight/input hidden_dim mismatch"
    out_dtype = x.dtype

    # --- parameter prep (one-time in a real model; cheap glue here) -----------
    n_pad = _round_up(dout, LANE)                     # lane-dense output width
    if n_pad != dout:
        weight = jnp.pad(weight, ((0, n_pad - dout), (0, 0)))
        bias = jnp.pad(bias, (0, n_pad - dout))
    b2d = bias.astype(jnp.float32).reshape(1, n_pad)

    # --- activation prep -------------------------------------------------------
    m_pad = _round_up(batch, SUBLANE)                 # sublane-aligned rows
    if m_pad != batch:
        x = jnp.pad(x, ((0, m_pad - batch), (0, 0)))

    if compute_dtype is not None:
        x = x.astype(compute_dtype)
        weight = weight.astype(compute_dtype)

    if m_pad <= block_m:
        # Small batch: single VMEM block per operand, no grid / pipeline bookkeeping.
        out = pl.pallas_call(
            _qnet_kernel,
            out_shape=jax.ShapeDtypeStruct((m_pad, n_pad), out_dtype),
        )(x, weight, b2d)
    else:
        # Larger batch: tile over M only (weight/bias stay resident), M axis is
        # "parallel" so v7x megacore can shard it across TensorCores.
        tm = block_m
        m_grid = _round_up(m_pad, tm)
        if m_grid != m_pad:
            x = jnp.pad(x, ((0, m_grid - m_pad), (0, 0)))
        out = pl.pallas_call(
            _qnet_kernel,
            out_shape=jax.ShapeDtypeStruct((m_grid, n_pad), out_dtype),
            grid_spec=pl.GridSpec(
                grid=(m_grid // tm,),
                in_specs=[
                    pl.BlockSpec((tm, hidden), lambda i: (i, 0)),
                    pl.BlockSpec((n_pad, hidden), lambda i: (0, 0)),
                    pl.BlockSpec((1, n_pad), lambda i: (0, 0)),
                ],
                out_specs=pl.BlockSpec((tm, n_pad), lambda i: (i, 0)),
            ),
            compiler_params=pltpu.CompilerParams(
                dimension_semantics=("parallel",),
            ),
        )(x, weight, b2d)

    # Slice padding back off (rows from sublane/tile padding, cols from lane padding).
    return out[:batch, :dout]


if __name__ == "__main__":
    hidden_dim = 32
    dout = 16
    batch = 8

    key = jax.random.PRNGKey(0)
    kx, kw, kb, kx2 = jax.random.split(key, 4)

    # Deterministic synthetic parameters (shapes match nn.Linear(hidden_dim, dout)).
    bound = 1.0 / (hidden_dim ** 0.5)
    weight = jax.random.uniform(kw, (dout, hidden_dim), jnp.float32, -bound, bound)
    bias = jax.random.uniform(kb, (dout,), jnp.float32, -bound, bound)

    # --- small-batch (gridless) path ------------------------------------------
    x = jax.random.normal(kx, (batch, hidden_dim), jnp.float32)
    q = q_net_forward(x, weight, bias)
    jax.block_until_ready(q)
    q_ref = x @ weight.T + bias
    assert q.shape == (batch, dout)
    assert jnp.allclose(q, q_ref, atol=1e-4, rtol=1e-4), "mismatch vs reference (small)"

    # --- larger-batch (M-tiled, parallel grid) path ----------------------------
    big_batch = 512
    x2 = jax.random.normal(kx2, (big_batch, hidden_dim), jnp.float32)
    q2 = q_net_forward(x2, weight, bias, block_m=256)
    jax.block_until_ready(q2)
    q2_ref = x2 @ weight.T + bias
    assert q2.shape == (big_batch, dout)
    assert jnp.allclose(q2, q2_ref, atol=1e-4, rtol=1e-4), "mismatch vs reference (tiled)"

    print("KERNEL_OK")
</pallas_src>

<mosaic_0001>
module attributes {stable_mosaic.version = 11 : i64} {
  func.func @_qnet_kernel(%arg0: memref<8x32xf32, #tpu.memory_space<vmem>>, %arg1: memref<128x32xf32, #tpu.memory_space<vmem>>, %arg2: memref<1x128xf32, #tpu.memory_space<vmem>>, %arg3: memref<8x128xf32, #tpu.memory_space<vmem>>) attributes {dimension_semantics = [], scalar_prefetch = 0 : i64, scratch_operands = 0 : i64, tpu.core_type = #tpu.core_type<tc>} {
    %c0 = arith.constant 0 : index
    %c0_0 = arith.constant 0 : index
    %0 = vector.load %arg0[%c0, %c0_0] : memref<8x32xf32, #tpu.memory_space<vmem>>, vector<8x32xf32>
    %c0_1 = arith.constant 0 : index
    %c0_2 = arith.constant 0 : index
    %1 = vector.load %arg1[%c0_1, %c0_2] : memref<128x32xf32, #tpu.memory_space<vmem>>, vector<128x32xf32>
    %cst = arith.constant dense<0.000000e+00> : vector<8x128xf32>
    %2 = tpu.matmul %0, %1, %cst {dimension_numbers = #tpu.dot_dimension_numbers<[1], [1], [0], [0], [0, 0, 1, 0], [], []>} : vector<8x32xf32>, vector<128x32xf32>, vector<8x128xf32> -> vector<8x128xf32>
    %c0_3 = arith.constant 0 : index
    %c0_4 = arith.constant 0 : index
    %3 = vector.load %arg2[%c0_3, %c0_4] : memref<1x128xf32, #tpu.memory_space<vmem>>, vector<1x128xf32>
    %4 = vector.broadcast %3 : vector<1x128xf32> to vector<8x128xf32>
    %5 = arith.addf %2, %4 : vector<8x128xf32>
    %c0_5 = arith.constant 0 : index
    %c0_6 = arith.constant 0 : index
    %6 = vector.load %arg3[%c0_5, %c0_6] : memref<8x128xf32, #tpu.memory_space<vmem>>, vector<8x128xf32>
    tpu.vector_store %arg3[%c0_5, %c0_6], %5 {strides = array<i32>} : memref<8x128xf32, #tpu.memory_space<vmem>>, vector<8x128xf32>,
    return
  }
}

</mosaic_0001>

<bundles_post_ra>
// kernel: tpu_custom_call.1
= control target key start
LH: loop header
LB: loop body
LE: loop exit
PB: predicated region body
PF: predicated region fallthrough
CT: control target
= control target key end

     0   :  { %vm36_vm0 = vcmask 261120   ;;  %s265_s0 = inlined_call_operand.vmem [shape: f32[8,32], index: 0, kind: input, shape index: {}]   ;;  %s266_s1 = inlined_call_operand.vmem [shape: f32[128,32], index: 1, kind: input, shape index: {}]   ;;  %s267_s2 = inlined_call_operand.vmem [shape: f32[1,128], index: 2, kind: input, shape index: {}]   ;;  %s268_s3 = inlined_call_operand.hbm [shape: f32[8,128], index: 3, kind: output, shape index: {}]  }
   0x1   :  { %v31_v0 = vld [vmem:[%s266_s1 + $0x78] sm:$0xff]  ;;  %v30_v1 = vld [vmem:[%s266_s1 + $0x70] sm:$0xff] }
   0x2   :  { %125 = vmatpush.xpose.msk.msra.mxu0 %vm36_vm0, %v31_v0 }
   0x3   :  { %8 = vsyncpa [#allocation3], 0  ;;  %v29_v2 = vld [vmem:[%s266_s1 + $0x68] sm:$0xff]  ;;  %v28_v3 = vld [vmem:[%s266_s1 + $0x60] sm:$0xff]  ;;  %s170_s21 = smov [#allocation2]   ;;  %s116_s25 = sshll.u32 %s268_s3, 4  ;;  %s117_s25 = int_to_ptr.hbm [resolvable:$true] %s116_s25 }
   0x4   :  { %v27_v4 = vld [vmem:[%s266_s1 + $0x58] sm:$0xff]  ;;  %v26_v5 = vld [vmem:[%s266_s1 + $0x50] sm:$0xff]  ;;  %v25_v6 = vld [vmem:[%s266_s1 + $0x48] sm:$0xff]  ;;  %s114_s22 = sshll.u32 %s170_s21, 4  ;;  %s115_s22 = int_to_ptr.vmem [resolvable:$true] %s114_s22 }
   0x5   :  { %v24_v7 = vld [vmem:[%s266_s1 + $0x40] sm:$0xff]  ;;  %v23_v8 = vld [vmem:[%s266_s1 + $0x38] sm:$0xff]  ;;  %v22_v9 = vld [vmem:[%s266_s1 + $0x30] sm:$0xff] }
   0x6   :  { %126 = vmatpush.xpose.msk.msra.mxu0 %vm36_vm0, %v30_v1  ;;  %v21_v10 = vld [vmem:[%s266_s1 + $0x28] sm:$0xff]  ;;  %v20_v11 = vld [vmem:[%s266_s1 + $0x20] sm:$0xff]  ;;  %v19_v12 = vld [vmem:[%s266_s1 + $0x18] sm:$0xff] }
   0x7   :  { %v18_v13 = vld [vmem:[%s266_s1 + $0x10] sm:$0xff]  ;;  %v17_v14 = vld [vmem:[%s266_s1 + $0x8] sm:$0xff]  ;;  %v16_v15 = vld [vmem:[%s266_s1] sm:$0xff] }
   0x8   :  { %v15_v16 = vld [vmem:[%s265_s0] sm:$0xff] }
   0x9   :  { %v143_v17 = vld [vmem:[%s267_s2] ss:$0 sm:$0xff] }
   0xa   :  { %127 = vmatpush.xpose.msk.msra.mxu0 %vm36_vm0, %v29_v2 }
   0xe   :  { %128 = vmatpush.xpose.msk.msra.mxu0 %vm36_vm0, %v28_v3 }
  0x12   :  { %129 = vmatpush.xpose.msk.msra.mxu0 %vm36_vm0, %v27_v4 }
  0x16   :  { %130 = vmatpush.xpose.msk.msra.mxu0 %vm36_vm0, %v26_v5 }
  0x1a   :  { %131 = vmatpush.xpose.msk.msra.mxu0 %vm36_vm0, %v25_v6 }
  0x1e   :  { %132 = vmatpush.xpose.msk.msra.mxu0 %vm36_vm0, %v24_v7 }
  0x22   :  { %133 = vmatpush.xpose.msk.msra.mxu0 %vm36_vm0, %v23_v8 }
  0x26   :  { %134 = vmatpush.xpose.msk.msra.mxu0 %vm36_vm0, %v22_v9 }
  0x2a   :  { %135 = vmatpush.xpose.msk.msra.mxu0 %vm36_vm0, %v21_v10 }
  0x2e   :  { %136 = vmatpush.xpose.msk.msra.mxu0 %vm36_vm0, %v20_v11 }
  0x32   :  { %137 = vmatpush.xpose.msk.msra.mxu0 %vm36_vm0, %v19_v12 }
  0x36   :  { %138 = vmatpush.xpose.msk.msra.mxu0 %vm36_vm0, %v18_v13 }
  0x3a   :  { %139 = vmatpush.xpose.msk.msra.mxu0 %vm36_vm0, %v17_v14 }
  0x3e   :  { %140 = vmatpush.xpose.msk.msra.mxu0 %vm36_vm0, %v16_v15 }
  0x41   :  { %141 = vmatmul.msk.f32.vlgmr.msra.gmra.mxu0 %vm36_vm0, %v15_v16 }
  0xbe   :  { %v105_v18 = vpop.f32.mrf.mxu0 }
  0xbf   :  { %v106_v19 = vadd.f32 %v143_v17, %v105_v18 }
  0xc1   :  { %108 = vst [vmem:[#allocation2] sm:$0xff] %v106_v19 }
  0xc2   :  { %119 = dma.vmem_to_hbm [thread:$0]  %s115_s22, 128, %s117_s25, [#allocation3]  }
  0xc3   :  { %168 = dma.done.wait [#allocation3], 128  }
  0xc4   :  { %169 = vsyncadd [#allocation3], 4294967168 }
  0xc5   :  { %124 = vsyncpa [#allocation3], 1 }

</bundles_post_ra>
